<compile_context>
chip_gen: v7x
topology: tpu7x:2x2x1
jax: 0.10.0
libtpu: 0.0.40
codegen_flags: <defaults>
</compile_context>

<pallas_src>
import jax
import jax.numpy as jnp
from jax import lax
from jax.experimental import pallas as pl
from jax.experimental.pallas import tpu as pltpu


def _saliency_kernel(ls_ref, x_ref, w_ref, b_ref, v_ref, o_ref):
    # ls_ref : VMEM (BB, 1) int32 valid lengths for this batch block
    # x_ref  : VMEM (BB, T, H) token features
    # w_ref  : VMEM (H, H)     projection weight (resident across grid)
    # b_ref  : VMEM (1, H)     projection bias
    # v_ref  : VMEM (1, H)     attention query vector (kept as a lane row)
    # o_ref  : VMEM (BB, T)    masked softmax attention weights (lane-dense)
    bb, t, h = x_ref.shape

    # One large-M projection matmul on the MXU; accumulate in f32.
    x2 = x_ref[...].reshape(bb * t, h)
    proj = jnp.dot(x2, w_ref[...], preferred_element_type=jnp.float32)
    hidden = jnp.tanh(proj + b_ref[...].astype(jnp.float32))          # (BB*T, H) f32

    # Additive-attention scores: VPU multiply + lane (XLU) reduce instead of
    # an N=1 MXU matmul.  Result is (BB, T) with T on the lane axis.
    v_row = v_ref[...].astype(jnp.float32)                            # (1, H)
    scores = jnp.sum(hidden.reshape(bb, t, h) * v_row, axis=-1)       # (BB, T)

    # Length-masked softmax along the lane (T) axis, f32 math throughout.
    pos = lax.broadcasted_iota(jnp.int32, (bb, t), 1)
    valid = pos < ls_ref[...]                                         # (BB,1) bcast
    masked = jnp.where(valid, scores, jnp.float32(-1e30))
    m = jnp.max(masked, axis=-1, keepdims=True)
    e = jnp.where(valid, jnp.exp(masked - m), jnp.float32(0.0))
    denom = jnp.sum(e, axis=-1, keepdims=True)
    denom = jnp.maximum(denom, jnp.float32(1e-30))   # guard: ls == 0 -> zeros, not NaN
    # Exact normalization (tiny block; keeps row sums == 1 to f32 precision).
    o_ref[...] = (e / denom).astype(o_ref.dtype)


def _choose_bb(batch, seq, target_rows=512):
    """Per-step batch block: divides `batch`, is a multiple of 8 (or the full
    batch, to satisfy the (8,128) sublane rule on the (BB, T) output block),
    and aims for >= target_rows fused matmul rows per grid step."""
    cands = [d for d in range(1, batch + 1)
             if batch % d == 0 and (d == batch or d % 8 == 0)]
    meeting = [d for d in cands if d * seq >= target_rows]
    return min(meeting) if meeting else max(cands)


def saliency_scorer(x, ls, w, b, v, *, target_rows=512):
    """Returns attention weights of shape (B, T), masked-softmaxed over T."""
    B, T, H = x.shape
    ls2 = ls.astype(jnp.int32).reshape(B, 1)
    b2 = b.reshape(1, H)
    v2 = v.reshape(1, H)

    bb = _choose_bb(B, T, target_rows)
    grid = (B // bb,)

    # VMEM estimate for the chosen block (double-buffered x/out/ls, resident
    # weights, plus f32 temporaries); raise the scoped limit only if needed.
    # TODO(synk): for very large H, tile the contraction dim with an f32
    # accumulator scratch instead of a single resident (H, H) weight.
    est = (2 * bb * T * H * x.dtype.itemsize
           + 2 * bb * T * 4
           + 2 * bb * 4
           + H * H * w.dtype.itemsize + 2 * H * 4
           + 4 * bb * T * H * 4)
    vmem_limit = None if est <= 32 * 1024 * 1024 else int(est + (8 << 20))

    out = pl.pallas_call(
        _saliency_kernel,
        out_shape=jax.ShapeDtypeStruct((B, T), jnp.float32),
        grid=grid,
        in_specs=[
            pl.BlockSpec((bb, 1), lambda i: (i, 0)),        # lengths
            pl.BlockSpec((bb, T, H), lambda i: (i, 0, 0)),  # x block (batch-fused)
            pl.BlockSpec((H, H), lambda i: (0, 0)),         # W (resident)
            pl.BlockSpec((1, H), lambda i: (0, 0)),         # bias row
            pl.BlockSpec((1, H), lambda i: (0, 0)),         # attention vector row
        ],
        out_specs=pl.BlockSpec((bb, T), lambda i: (i, 0)),  # lane-dense output
        compiler_params=pltpu.CompilerParams(
            dimension_semantics=("parallel",),
            vmem_limit_bytes=vmem_limit,
        ),
    )(ls2, x, w, b2, v2)
    return out  # (B, T)


def _reference(x, ls, w, b, v):
    h = jnp.tanh(jnp.einsum("bth,hk->btk", x, w) + b[None, None, :])
    scores = jnp.einsum("bth,h->bt", h, v)
    pos = jnp.arange(x.shape[1])[None, :]
    valid = pos < ls[:, None]
    masked = jnp.where(valid, scores, -1e30)
    e = jnp.where(valid, jnp.exp(masked - masked.max(-1, keepdims=True)), 0.0)
    return e / e.sum(-1, keepdims=True)


if __name__ == "__main__":
    B, T, H = 2, 8, 32
    key = jax.random.PRNGKey(0)
    kx, kw, kb, kv = jax.random.split(key, 4)

    x = jax.random.normal(kx, (B, T, H), dtype=jnp.float32)
    ls = jnp.array([8, 5], dtype=jnp.int32)

    # Deterministic synthetic parameters (shapes implied by the encoder).
    w = jax.random.normal(kw, (H, H), dtype=jnp.float32) * 0.1
    b = jax.random.normal(kb, (H,), dtype=jnp.float32) * 0.1
    v = jax.random.normal(kv, (H,), dtype=jnp.float32) * 0.1

    attn = saliency_scorer(x, ls, w, b, v)
    attn = jax.block_until_ready(attn)

    ref = _reference(x, ls, w, b, v)
    assert attn.shape == (B, T)
    assert jnp.allclose(attn, ref, atol=1e-4, rtol=1e-4)
    # Exact-division epilogue: valid rows sum to 1 within f32 rounding.
    assert jnp.allclose(attn.sum(-1), jnp.ones((B,)), atol=1e-3)
    # Padded (beyond-length) positions must be exactly zero.
    assert float(attn[1, 5:].sum()) == 0.0

    print("KERNEL_OK")
</pallas_src>

<mosaic_0001>
module attributes {stable_mosaic.version = 11 : i64} {
  func.func @_saliency_kernel(%arg0: i32, %arg1: memref<2x1xi32, #tpu.memory_space<vmem>>, %arg2: memref<2x8x32xf32, #tpu.memory_space<vmem>>, %arg3: memref<32x32xf32, #tpu.memory_space<vmem>>, %arg4: memref<1x32xf32, #tpu.memory_space<vmem>>, %arg5: memref<1x32xf32, #tpu.memory_space<vmem>>, %arg6: memref<2x8xf32, #tpu.memory_space<vmem>>) attributes {dimension_semantics = [#tpu.dimension_semantics<parallel>], iteration_bounds = array<i64: 1>, scalar_prefetch = 0 : i64, scratch_operands = 0 : i64, tpu.core_type = #tpu.core_type<tc>, window_params = [{transform_indices = @transform_0, window_bounds = array<i64: 2, 1>}, {transform_indices = @transform_1, window_bounds = array<i64: 2, 8, 32>}, {pipeline_mode = #tpu.pipeline_mode<synchronous>, transform_indices = @transform_2, window_bounds = array<i64: 32, 32>}, {pipeline_mode = #tpu.pipeline_mode<synchronous>, transform_indices = @transform_3, window_bounds = array<i64: 1, 32>}, {pipeline_mode = #tpu.pipeline_mode<synchronous>, transform_indices = @transform_4, window_bounds = array<i64: 1, 32>}, {transform_indices = @transform_5, window_bounds = array<i64: 2, 8>}]} {
    %c0 = arith.constant 0 : index
    %c0_0 = arith.constant 0 : index
    %c0_1 = arith.constant 0 : index
    %0 = vector.load %arg2[%c0, %c0_0, %c0_1] : memref<2x8x32xf32, #tpu.memory_space<vmem>>, vector<2x8x32xf32>
    %1 = vector.shape_cast %0 : vector<2x8x32xf32> to vector<16x32xf32>
    %c0_2 = arith.constant 0 : index
    %c0_3 = arith.constant 0 : index
    %2 = vector.load %arg3[%c0_2, %c0_3] : memref<32x32xf32, #tpu.memory_space<vmem>>, vector<32x32xf32>
    %cst = arith.constant dense<0.000000e+00> : vector<16x32xf32>
    %3 = tpu.matmul %1, %2, %cst {dimension_numbers = #tpu.dot_dimension_numbers<[1], [0], [0], [1], [0, 0, 1, 1], [], []>} : vector<16x32xf32>, vector<32x32xf32>, vector<16x32xf32> -> vector<16x32xf32>
    %c0_4 = arith.constant 0 : index
    %c0_5 = arith.constant 0 : index
    %4 = vector.load %arg4[%c0_4, %c0_5] : memref<1x32xf32, #tpu.memory_space<vmem>>, vector<1x32xf32>
    %5 = vector.broadcast %4 : vector<1x32xf32> to vector<16x32xf32>
    %6 = arith.addf %3, %5 : vector<16x32xf32>
    %7 = math.tanh %6 : vector<16x32xf32>
    %c0_6 = arith.constant 0 : index
    %c0_7 = arith.constant 0 : index
    %8 = vector.load %arg5[%c0_6, %c0_7] : memref<1x32xf32, #tpu.memory_space<vmem>>, vector<1x32xf32>
    %9 = vector.shape_cast %7 : vector<16x32xf32> to vector<2x8x32xf32>
    %10 = vector.shape_cast %8 : vector<1x32xf32> to vector<1x1x32xf32>
    %11 = vector.broadcast %10 : vector<1x1x32xf32> to vector<2x8x32xf32>
    %12 = arith.mulf %9, %11 : vector<2x8x32xf32>
    %cst_8 = arith.constant dense<0.000000e+00> : vector<2x8xf32>
    %13 = vector.multi_reduction <add>, %12, %cst_8 [2] : vector<2x8x32xf32> to vector<2x8xf32>
    %14 = tpu.iota {dimensions = array<i32: 1>} : vector<2x8xi32>
    %c0_9 = arith.constant 0 : index
    %c0_10 = arith.constant 0 : index
    %15 = vector.load %arg1[%c0_9, %c0_10] : memref<2x1xi32, #tpu.memory_space<vmem>>, vector<2x1xi32>
    %16 = vector.broadcast %15 : vector<2x1xi32> to vector<2x8xi32>
    %17 = arith.cmpi slt, %14, %16 : vector<2x8xi32>
    %cst_11 = arith.constant -1.000000e+30 : f32
    %18 = vector.broadcast %cst_11 : f32 to vector<2x8xf32>
    %19 = arith.select %17, %13, %18 : vector<2x8xi1>, vector<2x8xf32>
    %cst_12 = arith.constant dense<0xFF800000> : vector<2xf32>
    %20 = vector.multi_reduction <maximumf>, %19, %cst_12 [1] : vector<2x8xf32> to vector<2xf32>
    %21 = vector.shape_cast %20 : vector<2xf32> to vector<2x1xf32>
    %22 = vector.broadcast %21 : vector<2x1xf32> to vector<2x8xf32>
    %23 = arith.subf %19, %22 : vector<2x8xf32>
    %24 = math.exp %23 : vector<2x8xf32>
    %cst_13 = arith.constant 0.000000e+00 : f32
    %25 = vector.broadcast %cst_13 : f32 to vector<2x8xf32>
    %26 = arith.select %17, %24, %25 : vector<2x8xi1>, vector<2x8xf32>
    %cst_14 = arith.constant dense<0.000000e+00> : vector<2xf32>
    %27 = vector.multi_reduction <add>, %26, %cst_14 [1] : vector<2x8xf32> to vector<2xf32>
    %28 = vector.shape_cast %27 : vector<2xf32> to vector<2x1xf32>
    %cst_15 = arith.constant 1.000000e-30 : f32
    %29 = vector.broadcast %cst_15 : f32 to vector<2x1xf32>
    %30 = arith.maximumf %28, %29 : vector<2x1xf32>
    %31 = vector.broadcast %30 : vector<2x1xf32> to vector<2x8xf32>
    %32 = arith.divf %26, %31 : vector<2x8xf32>
    %c0_16 = arith.constant 0 : index
    %c0_17 = arith.constant 0 : index
    %33 = vector.load %arg6[%c0_16, %c0_17] : memref<2x8xf32, #tpu.memory_space<vmem>>, vector<2x8xf32>
    tpu.vector_store %arg6[%c0_16, %c0_17], %32 {strides = array<i32>} : memref<2x8xf32, #tpu.memory_space<vmem>>, vector<2x8xf32>,
    return
  }
  func.func @transform_0(%arg0: i32) -> (i32, i32) {
    %c0_i32 = arith.constant 0 : i32
    %c0_i32_0 = arith.constant 0 : i32
    return %arg0, %c0_i32 : i32, i32
  }
  func.func @transform_1(%arg0: i32) -> (i32, i32, i32) {
    %c0_i32 = arith.constant 0 : i32
    %c0_i32_0 = arith.constant 0 : i32
    %c0_i32_1 = arith.constant 0 : i32
    return %arg0, %c0_i32, %c0_i32_0 : i32, i32, i32
  }
  func.func @transform_2(%arg0: i32) -> (i32, i32) {
    %c0_i32 = arith.constant 0 : i32
    %c0_i32_0 = arith.constant 0 : i32
    %c0_i32_1 = arith.constant 0 : i32
    return %c0_i32, %c0_i32_0 : i32, i32
  }
  func.func @transform_3(%arg0: i32) -> (i32, i32) {
    %c0_i32 = arith.constant 0 : i32
    %c0_i32_0 = arith.constant 0 : i32
    %c0_i32_1 = arith.constant 0 : i32
    return %c0_i32, %c0_i32_0 : i32, i32
  }
  func.func @transform_4(%arg0: i32) -> (i32, i32) {
    %c0_i32 = arith.constant 0 : i32
    %c0_i32_0 = arith.constant 0 : i32
    %c0_i32_1 = arith.constant 0 : i32
    return %c0_i32, %c0_i32_0 : i32, i32
  }
  func.func @transform_5(%arg0: i32) -> (i32, i32) {
    %c0_i32 = arith.constant 0 : i32
    %c0_i32_0 = arith.constant 0 : i32
    return %arg0, %c0_i32 : i32, i32
  }
}

</mosaic_0001>

<bundles_post_ra>
// kernel: tpu_custom_call.1
= control target key start
LH: loop header
LB: loop body
LE: loop exit
PB: predicated region body
PF: predicated region fallthrough
CT: control target
= control target key end

     0   :  { %10 = vsyncpa [#allocation3], 0  ;;  %s418_s0 = inlined_call_operand.vmem [shape: s32[2,1], index: 0, kind: input, shape index: {}]   ;;  %s419_s1 = inlined_call_operand.hbm [shape: f32[2,8,32], index: 1, kind: input, shape index: {}]   ;;  %s420_s2 = inlined_call_operand.hbm [shape: f32[32,32], index: 2, kind: input, shape index: {}]   ;;  %s421_s3 = inlined_call_operand.vmem [shape: f32[1,32], index: 3, kind: input, shape index: {}]   ;;  %s422_s4 = inlined_call_operand.vmem [shape: f32[1,32], index: 4, kind: input, shape index: {}]   ;;  %s423_s5 = inlined_call_operand.hbm [shape: f32[2,8], index: 5, kind: output, shape index: {}]  }
   0x1   :  { %11 = vsyncpa [#allocation6], 0 }
   0x2   :  { %12 = vsyncpa [#allocation4], 0  ;;  %s330_s18 = smov [#allocation2]   ;;  %s258_s22 = scalar_lea.hbm %s419_s1, 256 }
   0x3   :  { %s20_s19 = sshll.u32 %s330_s18, 4  ;;  %p259_p0 = scmp.ne.s32.totalorder %s419_s1, %s258_s22  ;;  %s21_s19 = int_to_ptr.vmem [resolvable:$true] %s20_s19 }
   0x4   :  { %p262_p1 = scmp.lt.u32.totalorder %s258_s22, %s419_s1 }
   0x6   :  { %p264_p2 = pnand %p262_p1, %p259_p0 }
   0x8   :  { %267 = shalt.err (!%p264_p2)
}
   0x9   :  { %s268_s27 = scalar_lea.vmem %s21_s19, 256  ;;  %p273_p4 = scmp.lt.s32.totalorder %s21_s19, %s21_s19 }
   0xa   :  { %p269_p3 = scmp.ne.s32.totalorder %s21_s19, %s268_s27  ;;  %p274_p5 = scmp.lt.s32.totalorder %s268_s27, %s268_s27 }
   0xc   :  { %p275_p6 = por %p274_p5, %p273_p4 }
   0xe   :  { %p276_p7 = pnand %p275_p6, %p269_p3 }
  0x10   :  { %279 = shalt.err (!%p276_p7)
}
  0x11   :  { %s331_s28 = smov 128   ;;  %s332_s29 = smov 8  }
  0x12   :  { %26 = dma.hbm_to_vmem [thread:$0]  %s419_s1, 256, %s21_s19, [#allocation3], %s331_s28, %s331_s28, %s332_s29  }
  0x13   :  { %s333_s7 = smov [#allocation5]   ;;  %s280_s11 = scalar_lea.hbm %s420_s2, 512 }
  0x14   :  { %s32_s8 = sshll.u32 %s333_s7, 4  ;;  %p281_p8 = scmp.ne.s32.totalorder %s420_s2, %s280_s11  ;;  %s33_s8 = int_to_ptr.vmem [resolvable:$true] %s32_s8 }
  0x15   :  { %p284_p9 = scmp.lt.u32.totalorder %s280_s11, %s420_s2 }
  0x17   :  { %p286_p10 = pnand %p284_p9, %p281_p8 }
  0x19   :  { %289 = shalt.err (!%p286_p10)
}
  0x1a   :  { %s290_s16 = scalar_lea.vmem %s33_s8, 512  ;;  %p295_p12 = scmp.lt.s32.totalorder %s33_s8, %s33_s8 }
  0x1b   :  { %p291_p11 = scmp.ne.s32.totalorder %s33_s8, %s290_s16  ;;  %p296_p13 = scmp.lt.s32.totalorder %s290_s16, %s290_s16 }
  0x1d   :  { %p297_p0 = por %p296_p13, %p295_p12 }
  0x1f   :  { %p298_p1 = pnand %p297_p0, %p291_p11 }
  0x21   :  { %301 = shalt.err (!%p298_p1)
}
  0x22   :  { %38 = dma.hbm_to_vmem [thread:$0]  %s420_s2, 512, %s33_s8, [#allocation6], %s331_s28, %s331_s28, %s332_s29  }
  0x23   :  { %324 = dma.done.wait [#allocation3], 256  }
  0x24   :  { %325 = vsyncadd [#allocation3], 4294967040 }
  0x25   :  { %326 = dma.done.wait [#allocation6], 512  }
  0x26   :  { %327 = vsyncadd [#allocation6], 4294966784  ;;  %vm62_vm0 = vcmask 261120   ;;  %v51_v0 = vld [vmem:[#allocation5] sm:$0xff]  ;;  %v52_v1 = vld [vmem:[#allocation5 + $0x8] sm:$0xff]  ;;  %v334_v9 = vmov 0   ;;  %v161_v22 = vlaneseq }
  0x27   :  { %v53_v2 = vld [vmem:[#allocation5 + $0x10] sm:$0xff]  ;;  %v234_v3 = vpack.c.bf16 %v52_v1, %v51_v0  ;;  %v54_v4 = vld [vmem:[#allocation5 + $0x18] sm:$0xff]  ;;  %248 = vset.pattern.permute.xlu1 %v334_v9  ;;  %249 = vset.pattern.permute.xlu0 %v334_v9  ;;  %vm178_vm1 = vcmask 1041409   ;;  %vm182_vm3 = vcmask 58368  }
  0x28   :  { %v49_v5 = vld [vmem:[#allocation2] sm:$0xff]  ;;  %v238_v6 = vpack.c.bf16 %v54_v4, %v53_v2  ;;  %v50_v7 = vld [vmem:[#allocation2 + $0x8] sm:$0xff]  ;;  %v162_v23 = vand.u32 127, %v161_v22  ;;  %v171_v24 = vshrl.u32 %v161_v22, 7 }
  0x29   :  { %231 = vmatprep.mubr.msk.f32.mxu0 %vm62_vm0, %v49_v5  ;;  %235 = vmatprep.subr.bf16.mxu0 %v234_v3  ;;  %v163_v8 = vld [vmem:[%s418_s0] sm:$0x3]  ;;  %s335_s0 = smov [#allocation7]  }
  0x2a   :  { %237 = vmatpush3.bf16.msra.mxu0 %v234_v3  ;;  %165 = vperm.xlu1 %248, %v163_v8   ;;  %v213_v10 = vld [vmem:[%s421_s3] ss:$0 sm:$0xff]  ;;  %v172_v26 = vsub.s32 %v162_v23, %v171_v24  ;;  %s203_s3 = sshll.u32 %s335_s0, 4  ;;  %s204_s3 = int_to_ptr.vmem [resolvable:$true] %s203_s3 }
  0x2b   :  { %239 = vmatprep.subr.bf16.mxu0 %v238_v6  ;;  %v216_v15 = vld [vmem:[%s422_s4] ss:$0 sm:$0xff]  ;;  %s302_s4 = scalar_lea.vmem %s204_s3, 32  ;;  %p307_p3 = scmp.lt.s32.totalorder %s204_s3, %s204_s3 }
  0x2c   :  { %p303_p2 = scmp.ne.s32.totalorder %s204_s3, %s302_s4  ;;  %p308_p4 = scmp.lt.s32.totalorder %s302_s4, %s302_s4 }
  0x2e   :  { %241 = vmatpush3.bf16.msra.mxu0 %v238_v6  ;;  %p309_p5 = por %p308_p4, %p307_p3 }
  0x30   :  { %p310_p6 = pnand %p309_p5, %p303_p2 }
  0x31   :  { %232 = vmatmul.mubr.msk.f32.vlgmr.msra.gmra.mrb[0].mxu0 %vm62_vm0, %v50_v7 }
  0xa9   :  { %v166_v27 = vpop.permute.xlu1 %165 }
  0xaa   :  { %vm167_vm2 = vcmp.lt.s32.totalorder %v162_v23, %v166_v27 }
 0x104   :  { %v233_v11 = vpop.f32.mrb[0].mxu0 }
 0x105   :  { %v141_v12 = vadd.f32 %v233_v11, %v213_v10  ;;  %v135_v13 = vpop.f32.mrb[1].mxu0 }
 0x106   :  { %v136_v14 = vadd.f32 %v213_v10, %v135_v13 }
 0x107   :  { %250 = vtanh.f32 %v141_v12 }
 0x108   :  { %252 = vtanh.f32 %v136_v14 }
 0x111   :  { %v251_v16 = vpop.eup %250 }
 0x112   :  { %v253_v17 = vpop.eup %252  ;;  %v154_v20 = vmul.f32 %v251_v16, %v216_v15 }
 0x113   :  { %v153_v18 = vmul.f32 %v253_v17, %v216_v15 }
 0x114   :  { %v158_v21 = vsel %vm62_vm0, %v154_v20, 0.0 }
 0x115   :  { %v155_v19 = vsel %vm62_vm0, %v153_v18, 0.0 }
 0x116   :  { %156 = vadd.xlane.f32.xlu0 %v155_v19 }
 0x11a   :  { %159 = vadd.xlane.f32.xlu0 %v158_v21 }
 0x1a3   :  { %v157_v25 = vpop.xlane.xlu0 %156 }
 0x1a4   :  { %v173_v29 = vrot.slane %v157_v25, %v172_v26 }
 0x1a7   :  { %v160_v28 = vpop.xlane.xlu0 %159 }
 0x1a8   :  { %v177_v30 = vrot.slane %v160_v28, %v172_v26 }
 0x1aa   :  { %v179_v31 = vsel %vm178_vm1, %v177_v30, %v173_v29 }
 0x1ab   :  { %v181_v32 = vsel %vm167_vm2, %v179_v31, -1e+30 }
 0x1ac   :  { %v183_v33 = vsel %vm182_vm3, %v181_v32, -inf }
 0x1ad   :  { %184 = vmax.xlane.f32.xlu1 %v183_v33 }
 0x23a   :  { %v185_v34 = vpop.xlane.xlu1 %184 }
 0x23b   :  { %v186_v35 = vsub.f32 %v181_v32, %v185_v34 }
 0x23d   :  { %v187_v36 = vmul.f32 1.442695, %v186_v35 }
 0x23f   :  { %254 = vpow2.f32 %v187_v36 }
 0x249   :  { %v255_v37 = vpop.eup %254 }
 0x24a   :  { %v189_v38 = vsel %vm167_vm2, %v255_v37, 0.0 }
 0x24b   :  { %v190_v39 = vsel %vm182_vm3, %v189_v38, 0.0 }
 0x24c   :  { %191 = vadd.xlane.f32.xlu0 %v190_v39 }
 0x2d9   :  { %v192_v40 = vpop.xlane.xlu0 %191 }
 0x2da   :  { %v193_v41 = vmax.f32 %v192_v40, 1e-30 }
 0x2dc   :  { %256 = vrcp.f32 %v193_v41 }
 0x2e6   :  { %v257_v42 = vpop.eup %256 }
 0x2e7   :  { %v195_v43 = vmul.f32 %v257_v42, %v189_v38 }
 0x2e9   :  { %196 = vst.msk [vmem:[#allocation7] sm:$0x3] %vm182_vm3, %v195_v43 }
 0x2ea   :  { %313 = shalt.err (!%p310_p6)
}
 0x2eb   :  { %s314_s25 = scalar_lea.hbm %s423_s5, 32 }
 0x2ec   :  { %p315_p7 = scmp.ne.s32.totalorder %s423_s5, %s314_s25  ;;  %p318_p8 = scmp.lt.u32.totalorder %s314_s25, %s423_s5 }
 0x2ee   :  { %p320_p9 = pnand %p318_p8, %p315_p7 }
 0x2f0   :  { %323 = shalt.err (!%p320_p9)
}
 0x2f1   :  { %206 = dma.vmem_to_hbm [thread:$0]  %s204_s3, 32, %s423_s5, [#allocation4]  }
 0x2f2   :  { %328 = dma.done.wait [#allocation4], 32  }
 0x2f3   :  { %329 = vsyncadd [#allocation4], 4294967264 }
 0x2f4   :  { %210 = vsyncpa [#allocation3], 1 }
 0x2f5   :  { %211 = vsyncpa [#allocation6], 1 }
 0x2f6   :  { %212 = vsyncpa [#allocation4], 1 }

</bundles_post_ra>
